<compile_context>
chip_gen: v6e
topology: v6e:2x2x1
jax: 0.10.0
libtpu: 0.0.40
codegen_flags: <defaults>
</compile_context>

<pallas_src>
import functools

import jax
import jax.numpy as jnp
from jax.experimental import pallas as pl
from jax.experimental.pallas import tpu as pltpu


def _round_up(n, m):
    return ((n + m - 1) // m) * m


# ---------------------------------------------------------------------------
# Kernel: one MXU-filling matmul per (row-tile, col-tile) grid point.
#   y[i*tm:(i+1)*tm, j*tn:(j+1)*tn] = x_tile @ Wt_tile      (f32 accumulate)
# ---------------------------------------------------------------------------
def _bypass_project_kernel(x_ref, wt_ref, y_ref):
    y_ref[...] = jax.lax.dot_general(
        x_ref[...], wt_ref[...],
        dimension_numbers=(((1,), (0,)), ((), ())),   # [M,K] x [K,N]
        preferred_element_type=jnp.float32,
    ).astype(y_ref.dtype)


def _choose_tiles(rows, input_dim, internal_dim, bytes_el):
    """Pick (tm, tn) from an explicit VMEM budget (portable v5e/v6e/v7x)."""
    # Sublane packing: 8 rows/vreg for 32-bit, 16 for 16-bit dtypes.
    sub = 8 * max(1, 4 // bytes_el)

    # Column tile: full width when modest, otherwise 512 (multiple of 128;
    # fills the 2x256 v6e/v7x MXU and the 4x128 v5e MXU).
    tn = internal_dim if internal_dim <= 512 else 512

    # Pipeline-buffer VMEM budget: stay well inside v7x's 64 MiB physical VMEM
    # and under the vmem_limit_bytes we request below.
    budget = 24 * 1024 * 1024
    w_buf_bytes = 2 * input_dim * tn * bytes_el        # weight block, double-buffered
    per_row_bytes = 2 * (input_dim + tn) * bytes_el    # x tile + y tile, double-buffered

    if rows <= sub:
        return rows, tn                                # single full-extent row block

    tm = (budget - w_buf_bytes) // per_row_bytes
    tm = max(sub, min(512, (tm // sub) * sub))
    # v7x megacore: ensure >= 2 row tiles so 'parallel' actually shards work
    # across both TensorCores for small/medium batches.
    if rows <= tm:
        tm = max(sub, _round_up((rows + 1) // 2, sub))
    tm = min(tm, _round_up(rows, sub))
    return tm, tn


@functools.partial(jax.jit, static_argnames=("bottleneck_dim", "compute_dtype"))
def bypass_start_forward(x, weight, *, bottleneck_dim, compute_dtype=None):
    """x: [batch, seq, input_dim]; weight: [internal_dim, input_dim].

    Returns (bottleneck, bypass):
      bottleneck: [batch, seq, bottleneck_dim]
      bypass    : [batch, seq, internal_dim - bottleneck_dim]

    compute_dtype: optional opt-in operand dtype (e.g. jnp.bfloat16) for the
    MXU; accumulation stays f32 and outputs keep x.dtype.
    """
    batch, seq, input_dim = x.shape
    internal_dim = weight.shape[0]
    bypass_dim = internal_dim - bottleneck_dim
    rows = batch * seq
    out_dtype = x.dtype

    cdtype = jnp.dtype(compute_dtype) if compute_dtype is not None else jnp.dtype(x.dtype)
    bytes_el = cdtype.itemsize

    x2d = x.reshape(rows, input_dim).astype(cdtype)
    # Pre-transpose once at the XLA level: MXU-native [K, N] RHS layout, no
    # in-kernel XLU transpose.
    wt = weight.T.astype(cdtype)                       # [input_dim, internal_dim]

    tm, tn = _choose_tiles(rows, input_dim, internal_dim, bytes_el)
    grid = (pl.cdiv(rows, tm), pl.cdiv(internal_dim, tn))

    flops = 2 * rows * input_dim * internal_dim
    bytes_accessed = ((rows * input_dim + input_dim * internal_dim) * bytes_el
                      + rows * internal_dim * jnp.dtype(out_dtype).itemsize)

    y2d = pl.pallas_call(
        _bypass_project_kernel,
        out_shape=jax.ShapeDtypeStruct((rows, internal_dim), out_dtype),
        grid_spec=pltpu.PrefetchScalarGridSpec(
            num_scalar_prefetch=0,
            grid=grid,
            in_specs=[
                # Activations: row tile, resident across the column axis.
                pl.BlockSpec((tm, input_dim), lambda i, j: (i, 0)),
                # Weight: column tile, constant across the row axis (fetched
                # once whenever internal_dim fits a single column tile).
                # TODO(synk): pipeline_mode=pl.Buffered(1) would halve the
                # weight VMEM footprint; left at the default double-buffer
                # for maximum portability (footprint already budgeted for).
                pl.BlockSpec((input_dim, tn), lambda i, j: (0, j)),
            ],
            out_specs=pl.BlockSpec((tm, tn), lambda i, j: (i, j)),
        ),
        compiler_params=pltpu.CompilerParams(
            # Row and column tiles are independent -> shard across both
            # TensorCores on v7x megacore; no-op on single-TC v5e/v6e.
            dimension_semantics=("parallel", "parallel"),
            # Explicit scoped-VMEM limit: above v5e's 16 MiB default, below
            # v7x's 64 MiB physical.
            vmem_limit_bytes=48 * 1024 * 1024,
        ),
        cost_estimate=pl.CostEstimate(
            flops=flops, transcendentals=0, bytes_accessed=bytes_accessed),
    )(x2d, wt)

    # Lane-dense single kernel output; the bottleneck/bypass split is cheap
    # XLA slicing (also handles bottleneck_dim == 0 or == internal_dim).
    bottleneck = y2d[:, :bottleneck_dim].reshape(batch, seq, bottleneck_dim)
    bypass = y2d[:, bottleneck_dim:].reshape(batch, seq, bypass_dim)
    return bottleneck, bypass


# ---------------------------------------------------------------------------
# Deterministic parameter init (mirrors nn.init.orthogonal_ on [internal, input])
# ---------------------------------------------------------------------------
def make_orthogonal_weight(key, internal_dim, input_dim, dtype=jnp.float32):
    a = jax.random.normal(key, (internal_dim, input_dim), dtype=jnp.float32)
    q, r = jnp.linalg.qr(a.T if internal_dim > input_dim else a)
    d = jnp.sign(jnp.diag(r))
    q = q * d[None, :]
    w = q.T if internal_dim > input_dim else q
    return w.astype(dtype)


# ---------------------------------------------------------------------------
# Pure-JAX reference for correctness checking
# ---------------------------------------------------------------------------
def _reference(x, weight, bottleneck_dim):
    y = jnp.einsum("bsi,ni->bsn", x, weight)
    return y[..., :bottleneck_dim], y[..., bottleneck_dim:]


if __name__ == "__main__":
    key = jax.random.PRNGKey(0)
    k_w, k_x = jax.random.split(key)

    # Small shapes consistent with BypassCore(input_dim, bottleneck_dim, bypass_dim)
    batch, seq = 2, 8
    input_dim = 32
    bottleneck_dim = 16
    bypass_dim = 16
    internal_dim = bottleneck_dim + bypass_dim

    weight = make_orthogonal_weight(k_w, internal_dim, input_dim)
    x = jax.random.normal(k_x, (batch, seq, input_dim), dtype=jnp.float32)

    # Default (f32 operand) path — tight tolerance.
    bottleneck, bypass = bypass_start_forward(x, weight, bottleneck_dim=bottleneck_dim)
    jax.block_until_ready((bottleneck, bypass))

    ref_bn, ref_bp = _reference(x, weight, bottleneck_dim)
    assert bottleneck.shape == (batch, seq, bottleneck_dim)
    assert bypass.shape == (batch, seq, bypass_dim)
    assert jnp.allclose(bottleneck, ref_bn, atol=1e-5, rtol=1e-5)
    assert jnp.allclose(bypass, ref_bp, atol=1e-5, rtol=1e-5)

    # Opt-in bf16 operand path (f32 accumulation) — looser tolerance.
    bn16, bp16 = bypass_start_forward(
        x, weight, bottleneck_dim=bottleneck_dim, compute_dtype=jnp.bfloat16)
    jax.block_until_ready((bn16, bp16))
    assert jnp.allclose(bn16, ref_bn, atol=5e-2, rtol=5e-2)
    assert jnp.allclose(bp16, ref_bp, atol=5e-2, rtol=5e-2)

    # TODO(synk): StreamTensor isolate()/stream_merge() named-stream merge is
    # pure Python dict bookkeeping with no Pallas equivalent; left outside.
    print("KERNEL_OK")
</pallas_src>

<mosaic_0001>
module attributes {stable_mosaic.version = 11 : i64} {
  func.func @_bypass_project_kernel(%arg0: i32, %arg1: i32, %arg2: memref<8x32xf32, #tpu.memory_space<vmem>>, %arg3: memref<32x32xf32, #tpu.memory_space<vmem>>, %arg4: memref<8x32xf32, #tpu.memory_space<vmem>>) attributes {dimension_semantics = [#tpu.dimension_semantics<parallel>, #tpu.dimension_semantics<parallel>], iteration_bounds = array<i64: 2, 1>, scalar_prefetch = 0 : i64, scratch_operands = 0 : i64, tpu.core_type = #tpu.core_type<tc>, window_params = [{transform_indices = @transform_0, window_bounds = array<i64: 8, 32>}, {transform_indices = @transform_1, window_bounds = array<i64: 32, 32>}, {transform_indices = @transform_2, window_bounds = array<i64: 8, 32>}]} {
    %c0 = arith.constant 0 : index
    %c0_0 = arith.constant 0 : index
    %0 = vector.load %arg2[%c0, %c0_0] : memref<8x32xf32, #tpu.memory_space<vmem>>, vector<8x32xf32>
    %c0_1 = arith.constant 0 : index
    %c0_2 = arith.constant 0 : index
    %1 = vector.load %arg3[%c0_1, %c0_2] : memref<32x32xf32, #tpu.memory_space<vmem>>, vector<32x32xf32>
    %cst = arith.constant dense<0.000000e+00> : vector<8x32xf32>
    %2 = tpu.matmul %0, %1, %cst {dimension_numbers = #tpu.dot_dimension_numbers<[1], [0], [0], [1], [0, 0, 1, 1], [], []>} : vector<8x32xf32>, vector<32x32xf32>, vector<8x32xf32> -> vector<8x32xf32>
    %c0_3 = arith.constant 0 : index
    %c0_4 = arith.constant 0 : index
    %3 = vector.load %arg4[%c0_3, %c0_4] : memref<8x32xf32, #tpu.memory_space<vmem>>, vector<8x32xf32>
    tpu.vector_store %arg4[%c0_3, %c0_4], %2 {strides = array<i32>} : memref<8x32xf32, #tpu.memory_space<vmem>>, vector<8x32xf32>,
    return
  }
  func.func @transform_0(%arg0: i32, %arg1: i32) -> (i32, i32) {
    %c0_i32 = arith.constant 0 : i32
    %c0_i32_0 = arith.constant 0 : i32
    return %arg0, %c0_i32 : i32, i32
  }
  func.func @transform_1(%arg0: i32, %arg1: i32) -> (i32, i32) {
    %c0_i32 = arith.constant 0 : i32
    %c0_i32_0 = arith.constant 0 : i32
    return %c0_i32, %arg1 : i32, i32
  }
  func.func @transform_2(%arg0: i32, %arg1: i32) -> (i32, i32) {
    %c0_i32 = arith.constant 0 : i32
    return %arg0, %arg1 : i32, i32
  }
}

</mosaic_0001>

<bundles_post_ra>
// kernel: bypass_start_forward.1
= control target key start
LH: loop header
LB: loop body
LE: loop exit
PB: predicated region body
PF: predicated region fallthrough
CT: control target
= control target key end

     0   :  { %s437_s9 = smov 0   ;;  %s439_s10 = smov 0   ;;  %s482_s0 = inlined_call_operand.vmem [shape: f32[16,32], index: 0, kind: input, shape index: {}]   ;;  %s483_s1 = inlined_call_operand.vmem [shape: f32[32,32], index: 1, kind: input, shape index: {}]   ;;  %s484_s2 = inlined_call_operand.vmem [shape: f32[16,32], index: 2, kind: output, shape index: {}]  }
   0x1   :  { %s441_s11 = smov 0  }
   0x2 LB: > { %s24_s12 = sadd.s32 1, %s414_s10  ;;  %p348_p0 = scmp.ge.s32.totalorder %s418_s11, 1  ;;  %s418_s11 = sphi %s441_s11, %s12_s11   ;;  %s414_s10 = sphi %s439_s10, %s486_s10   ;;  %s410_s9 = sphi %s437_s9, %s485_s9  }
   0x3   : > { %p26_p1 = scmp.ge.s32.totalorder %s24_s12, 2  ;;  %p134_p2 = scmp.lt.s32.totalorder %s418_s11, 3 }
   0x5   : > { %s488_s12 = smov (%p26_p1, %s24_s12), 0  ;;  %p135_p3 = pnand %p348_p0, %p134_p2 }
   0x6   : > { %p161_p4 = scmp.lt.s32.totalorder (!%p135_p3), %s410_s9, 1 }
   0x7   : > { %138 = sbr.rel (%p135_p3) target bundleno = 216 (0xd8), region = 28 }
   0xc   : > { %v180_v0 = vld [vmem:[%s483_s1 + $0x18] sm:$0xff]  ;;  %v420_v1 = vmov 0.0   ;;  %v179_v2 = vld [vmem:[%s483_s1 + $0x10] sm:$0xff]  ;;  %vm421_vm0 = vmmov 0   ;;  %s490_s9 = smov (!%p161_p4, %s410_s9), 1  ;;  %v178_v3 = vld [vmem:[%s483_s1 + $0x8] sm:$0xff] }
   0xd   : > { %359 = vmatprep.subr.mxu0 %v420_v1  ;;  %367 = vmatprep.mubr.msk.f32.mxu0 %vm421_vm0, %v420_v1  ;;  %s349_s19 = sshll.u32 %s490_s9, 3  ;;  %v177_v4 = vld [vmem:[%s483_s1] sm:$0xff]  ;;  %vm181_vm1 = vcmask 261120  }
   0xe   : > { %360 = vmatpush3.msra.mxu0 %v180_v0  ;;  %s164_s24 = scalar_lea.vmem %s482_s0, %s349_s19  ;;  %s175_s27 = scalar_lea.vmem %s484_s2, %s349_s19 }
   0xf   : > { %361 = vmatprep.subr.mxu0 %v420_v1  ;;  %v176_v5 = vld [vmem:[%s164_s24] sm:$0xff] }
  0x10   : > { %362 = vmatpush3.msra.mxu0 %v179_v2 }
  0x11   : > { %363 = vmatprep.subr.mxu0 %v420_v1 }
  0x12   : > { %364 = vmatpush3.msra.mxu0 %v178_v3 }
  0x13   : > { %365 = vmatprep.subr.mxu0 %v420_v1 }
  0x14   : > { %366 = vmatpush3.msra.mxu0 %v177_v4 }
  0x15   : > { %368 = vmatmul.mubr.msk.f32.vlgmr.msra.gmra.mxu0 %vm181_vm1, %v176_v5 }
  0xd5   : > { %v251_v6 = vpop.f32.mrf.mxu0 }
  0xd6   : > { %255 = vst.msk [vmem:[%s175_s27] sm:$0xff] %vm181_vm1, %v251_v6 }
  0xd7   : > { %v369_v7 = vpop.f32.mrf.mxu0 }
  0xd8 PF: > { %s12_s11 = sadd.s32 1, %s418_s11   ;;  %s485_s9 = smov %s414_s10 }
  0xd9   : > { %p9_p5 = scmp.ge.s32.totalorder %s12_s11, 4   ;;  %s486_s10 = smov %s488_s12 }
  0xdb   :  { %11 = sbr.rel (!%p9_p5) target bundleno = 2 (0x2), region = 61 }

</bundles_post_ra>
